<compile_context>
chip_gen: v5e
topology: v5e:2x2
jax: 0.10.0
libtpu: 0.0.40
codegen_flags: <defaults>
</compile_context>

<pallas_src>
import jax
import jax.numpy as jnp
from jax.experimental import pallas as pl
from jax.experimental.pallas import tpu as pltpu

IN_FEATURES = 28 * 28
NUM_CLASSES = 10
OUT_PAD = 128          # lane-dense output width (sliced to 10 in the wrapper)
DEFAULT_TILE_B = 1024  # past the HBM-roofline knee; capped per-batch below


def _round_up(x: int, m: int) -> int:
    return ((x + m - 1) // m) * m


def _vmem_budget_bytes() -> int:
    """Per-generation physical VMEM (v5e/v6e: 128 MiB, v7x: 64 MiB per TC)."""
    try:
        info = pltpu.get_tpu_info()
        cap = getattr(info, "vmem_capacity_bytes", None)
        if cap:
            return int(min(max(int(cap), 32 * 1024 * 1024), 128 * 1024 * 1024))
    except Exception:
        pass
    return 64 * 1024 * 1024  # conservative fallback (v7x per-core figure)


def _choose_tile_b(batch: int, target: int) -> int:
    """Batch tile: >=2 grid steps for large batches (v7x megacore), 16-row
    rounding (bf16 sublane packing), never larger than the batch itself."""
    if batch <= 16:
        return batch                      # single full-extent block
    half = _round_up(pl.cdiv(batch, 2), 16)
    return max(16, min(target, half))


def _mlp_kernel(x_ref,
                w1_ref, b1_ref,
                w2_ref, b2_ref,
                w3_ref, b3_ref,
                w4_ref, b4_ref,
                o_ref):
    """Fused 4-layer MLP for one batch tile: (Linear+ReLU) x3 then Linear."""
    # x arrives as float32; cast to the weights' dtype on the VPU (free under
    # DMA/MXU slack). No wrapper-side cast pass over HBM.
    x = x_ref[...].astype(w1_ref.dtype)                                  # (TB, 784)

    h = jnp.dot(x, w1_ref[...], preferred_element_type=jnp.float32) + b1_ref[...]
    h = jnp.maximum(h, 0.0)

    h = jnp.dot(h.astype(w2_ref.dtype), w2_ref[...],
                preferred_element_type=jnp.float32) + b2_ref[...]
    h = jnp.maximum(h, 0.0)

    h = jnp.dot(h.astype(w3_ref.dtype), w3_ref[...],
                preferred_element_type=jnp.float32) + b3_ref[...]
    h = jnp.maximum(h, 0.0)

    logits = jnp.dot(h.astype(w4_ref.dtype), w4_ref[...],
                     preferred_element_type=jnp.float32) + b4_ref[...]
    o_ref[...] = logits.astype(o_ref.dtype)                              # (TB, 128)


def prepare_params(params, compute_dtype=jnp.bfloat16):
    """One-time (model-load) padding + cast of the weights/biases.

    Zero-padding is exact: padded hidden columns get 0 pre-activation -> ReLU 0
    -> contribute nothing downstream; padded output columns are 0 and sliced off.
    """
    (w1, b1), (w2, b2), (w3, b3), (w4, b4) = params
    hidden = w1.shape[1]
    h_pad = _round_up(max(hidden, 128), 128)

    def pad2(a, rows, cols, dtype):
        a = jnp.asarray(a)
        if a.ndim == 1:
            a = a.reshape(1, -1)
        return jnp.pad(a, ((0, rows - a.shape[0]), (0, cols - a.shape[1]))).astype(dtype)

    return (
        pad2(w1, IN_FEATURES, h_pad, compute_dtype), pad2(b1, 1, h_pad, jnp.float32),
        pad2(w2, h_pad, h_pad, compute_dtype),       pad2(b2, 1, h_pad, jnp.float32),
        pad2(w3, h_pad, h_pad, compute_dtype),       pad2(b3, 1, h_pad, jnp.float32),
        pad2(w4, h_pad, OUT_PAD, compute_dtype),     pad2(b4, 1, OUT_PAD, jnp.float32),
    )


def digit_recognizer_mlp(x, prepared_params, *, tile_b=DEFAULT_TILE_B,
                         unpad_output=True):
    """Forward pass. x: (B, 1, 28, 28) float32 -> (B, 10) logits in the
    compute dtype (bf16 by default). Pass unpad_output=False to get the
    lane-dense (B, 128) padded slab and skip the slice pass."""
    w1p, b1p, w2p, b2p, w3p, b3p, w4p, b4p = prepared_params
    B = x.shape[0]
    x_flat = x.reshape(B, -1)                       # free metadata reshape, stays f32
    assert x_flat.shape[1] == IN_FEATURES
    h_pad = w1p.shape[1]
    out_dtype = w1p.dtype

    tile_b = _choose_tile_b(B, tile_b)

    # --- VMEM budgeting (generation-gated) -------------------------------
    budget = _vmem_budget_bytes()
    resident_bytes = sum(int(a.size) * a.dtype.itemsize for a in prepared_params)

    def stream_bytes(tb):
        return (2 * tb * IN_FEATURES * x_flat.dtype.itemsize      # x double-buffer (f32)
                + 2 * tb * OUT_PAD * jnp.dtype(out_dtype).itemsize)  # out double-buffer

    margin = 4 * 1024 * 1024                        # compiler scratch / semaphores
    soft_cap = int(0.85 * budget)

    # Residents have a constant index_map and are never re-fetched: drop to a
    # single buffer when double-buffering them would pressure VMEM (mainly v7x,
    # large hidden). Otherwise keep the default double buffering.
    weight_buffers = 2
    if 2 * resident_bytes + stream_bytes(tile_b) + margin > soft_cap:
        weight_buffers = 1
    while (weight_buffers * resident_bytes + stream_bytes(tile_b) + margin > soft_cap
           and tile_b >= 128):
        tile_b //= 2                                # last resort: shrink the batch tile
    vmem_needed = weight_buffers * resident_bytes + stream_bytes(tile_b) + margin
    vmem_limit = int(min(budget, max(vmem_needed + 8 * 1024 * 1024, 32 * 1024 * 1024)))

    # Partial last tile handled by Pallas (edge rows' garbage never written
    # back past B; nothing reduces over batch inside the kernel) -> no jnp.pad.
    grid = (pl.cdiv(B, tile_b),)

    def resident(shape):
        if weight_buffers == 1:
            return pl.BlockSpec(shape, lambda i: (0, 0),
                                pipeline_mode=pl.Buffered(buffer_count=1))
        return pl.BlockSpec(shape, lambda i: (0, 0))

    out = pl.pallas_call(
        _mlp_kernel,
        out_shape=jax.ShapeDtypeStruct((B, OUT_PAD), out_dtype),
        grid_spec=pltpu.PrefetchScalarGridSpec(
            num_scalar_prefetch=0,
            grid=grid,
            in_specs=[
                pl.BlockSpec((tile_b, IN_FEATURES), lambda i: (i, 0)),  # streamed x (f32)
                resident((IN_FEATURES, h_pad)), resident((1, h_pad)),
                resident((h_pad, h_pad)),       resident((1, h_pad)),
                resident((h_pad, h_pad)),       resident((1, h_pad)),
                resident((h_pad, OUT_PAD)),     resident((1, OUT_PAD)),
            ],
            out_specs=pl.BlockSpec((tile_b, OUT_PAD), lambda i: (i, 0)),
        ),
        compiler_params=pltpu.CompilerParams(
            dimension_semantics=("parallel",),      # megacore sharding on v7x
            vmem_limit_bytes=vmem_limit,
        ),
    )(x_flat, w1p, b1p, w2p, b2p, w3p, b3p, w4p, b4p)

    if unpad_output:
        return out[:, :NUM_CLASSES]
    return out


def init_params(key, hidden_units):
    """Deterministic init mirroring nn.Linear shapes (weights stored (in, out))."""
    def linear(k, fan_in, fan_out):
        kw, kb = jax.random.split(k)
        bound = 1.0 / (fan_in ** 0.5)     # PyTorch default U(-1/sqrt(fan_in), +...)
        w = jax.random.uniform(kw, (fan_in, fan_out), jnp.float32, -bound, bound)
        b = jax.random.uniform(kb, (1, fan_out), jnp.float32, -bound, bound)
        return w, b

    k1, k2, k3, k4 = jax.random.split(key, 4)
    return (
        linear(k1, IN_FEATURES, hidden_units),
        linear(k2, hidden_units, hidden_units),
        linear(k3, hidden_units, hidden_units),
        linear(k4, hidden_units, NUM_CLASSES),
    )


def _reference(x, params):
    (w1, b1), (w2, b2), (w3, b3), (w4, b4) = params
    h = x.reshape(x.shape[0], -1)
    h = jnp.maximum(h @ w1 + b1, 0.0)
    h = jnp.maximum(h @ w2 + b2, 0.0)
    h = jnp.maximum(h @ w3 + b3, 0.0)
    return h @ w4 + b4


if __name__ == "__main__":
    key = jax.random.PRNGKey(0)
    k_params, k_x = jax.random.split(key)

    hidden_units = 32
    batch = 8
    params = init_params(k_params, hidden_units)
    x = jax.random.normal(k_x, (batch, 1, 28, 28), dtype=jnp.float32)
    ref = _reference(x, params)

    fwd = jax.jit(digit_recognizer_mlp)

    # Default deployment path: bf16 weights / f32 accumulation, bf16 logits.
    p_bf16 = prepare_params(params, jnp.bfloat16)   # one-time, out of the per-call path
    logits = jax.block_until_ready(fwd(x, p_bf16))
    assert logits.shape == (batch, NUM_CLASSES)
    assert logits.dtype == jnp.bfloat16
    assert jnp.allclose(logits.astype(jnp.float32), ref, atol=2e-2, rtol=2e-2)

    # float32 path: tighter tolerance.
    p_f32 = prepare_params(params, jnp.float32)
    logits_f32 = jax.block_until_ready(fwd(x, p_f32))
    assert logits_f32.shape == (batch, NUM_CLASSES)
    assert jnp.allclose(logits_f32, ref, atol=1e-3, rtol=1e-3)

    # Ragged batch: exercises multi-step grid + Pallas partial last tile (no pad copy).
    x_ragged = jax.random.normal(jax.random.PRNGKey(1), (20, 1, 28, 28), jnp.float32)
    ref_r = _reference(x_ragged, params)
    logits_r = jax.block_until_ready(fwd(x_ragged, p_bf16))
    assert logits_r.shape == (20, NUM_CLASSES)
    assert jnp.allclose(logits_r.astype(jnp.float32), ref_r, atol=2e-2, rtol=2e-2)

    print("KERNEL_OK")
</pallas_src>

<mosaic_0001>
module attributes {stable_mosaic.version = 11 : i64} {
  func.func @_mlp_kernel(%arg0: i32, %arg1: memref<8x784xf32, #tpu.memory_space<vmem>>, %arg2: memref<784x128xbf16, #tpu.memory_space<vmem>>, %arg3: memref<1x128xf32, #tpu.memory_space<vmem>>, %arg4: memref<128x128xbf16, #tpu.memory_space<vmem>>, %arg5: memref<1x128xf32, #tpu.memory_space<vmem>>, %arg6: memref<128x128xbf16, #tpu.memory_space<vmem>>, %arg7: memref<1x128xf32, #tpu.memory_space<vmem>>, %arg8: memref<128x128xbf16, #tpu.memory_space<vmem>>, %arg9: memref<1x128xf32, #tpu.memory_space<vmem>>, %arg10: memref<8x128xbf16, #tpu.memory_space<vmem>>) attributes {dimension_semantics = [#tpu.dimension_semantics<parallel>], iteration_bounds = array<i64: 1>, scalar_prefetch = 0 : i64, scratch_operands = 0 : i64, tpu.core_type = #tpu.core_type<tc>, window_params = [{transform_indices = @transform_0, window_bounds = array<i64: 8, 784>}, {pipeline_mode = #tpu.pipeline_mode<synchronous>, transform_indices = @transform_1, window_bounds = array<i64: 784, 128>}, {pipeline_mode = #tpu.pipeline_mode<synchronous>, transform_indices = @transform_2, window_bounds = array<i64: 1, 128>}, {pipeline_mode = #tpu.pipeline_mode<synchronous>, transform_indices = @transform_3, window_bounds = array<i64: 128, 128>}, {pipeline_mode = #tpu.pipeline_mode<synchronous>, transform_indices = @transform_4, window_bounds = array<i64: 1, 128>}, {pipeline_mode = #tpu.pipeline_mode<synchronous>, transform_indices = @transform_5, window_bounds = array<i64: 128, 128>}, {pipeline_mode = #tpu.pipeline_mode<synchronous>, transform_indices = @transform_6, window_bounds = array<i64: 1, 128>}, {pipeline_mode = #tpu.pipeline_mode<synchronous>, transform_indices = @transform_7, window_bounds = array<i64: 128, 128>}, {pipeline_mode = #tpu.pipeline_mode<synchronous>, transform_indices = @transform_8, window_bounds = array<i64: 1, 128>}, {transform_indices = @transform_9, window_bounds = array<i64: 8, 128>}]} {
    %c0 = arith.constant 0 : index
    %c0_0 = arith.constant 0 : index
    %0 = vector.load %arg1[%c0, %c0_0] : memref<8x784xf32, #tpu.memory_space<vmem>>, vector<8x784xf32>
    %1 = arith.truncf %0 : vector<8x784xf32> to vector<8x784xbf16>
    %c0_1 = arith.constant 0 : index
    %c0_2 = arith.constant 0 : index
    %2 = vector.load %arg2[%c0_1, %c0_2] : memref<784x128xbf16, #tpu.memory_space<vmem>>, vector<784x128xbf16>
    %cst = arith.constant dense<0.000000e+00> : vector<8x128xf32>
    %3 = tpu.matmul %1, %2, %cst {dimension_numbers = #tpu.dot_dimension_numbers<[1], [0], [0], [1], [0, 0, 1, 1], [], []>} : vector<8x784xbf16>, vector<784x128xbf16>, vector<8x128xf32> -> vector<8x128xf32>
    %c0_3 = arith.constant 0 : index
    %c0_4 = arith.constant 0 : index
    %4 = vector.load %arg3[%c0_3, %c0_4] : memref<1x128xf32, #tpu.memory_space<vmem>>, vector<1x128xf32>
    %5 = vector.broadcast %4 : vector<1x128xf32> to vector<8x128xf32>
    %6 = arith.addf %3, %5 : vector<8x128xf32>
    %cst_5 = arith.constant 0.000000e+00 : f32
    %7 = vector.broadcast %cst_5 : f32 to vector<8x128xf32>
    %8 = arith.maximumf %6, %7 : vector<8x128xf32>
    %9 = arith.truncf %8 : vector<8x128xf32> to vector<8x128xbf16>
    %c0_6 = arith.constant 0 : index
    %c0_7 = arith.constant 0 : index
    %10 = vector.load %arg4[%c0_6, %c0_7] : memref<128x128xbf16, #tpu.memory_space<vmem>>, vector<128x128xbf16>
    %cst_8 = arith.constant dense<0.000000e+00> : vector<8x128xf32>
    %11 = tpu.matmul %9, %10, %cst_8 {dimension_numbers = #tpu.dot_dimension_numbers<[1], [0], [0], [1], [0, 0, 1, 1], [], []>} : vector<8x128xbf16>, vector<128x128xbf16>, vector<8x128xf32> -> vector<8x128xf32>
    %c0_9 = arith.constant 0 : index
    %c0_10 = arith.constant 0 : index
    %12 = vector.load %arg5[%c0_9, %c0_10] : memref<1x128xf32, #tpu.memory_space<vmem>>, vector<1x128xf32>
    %13 = vector.broadcast %12 : vector<1x128xf32> to vector<8x128xf32>
    %14 = arith.addf %11, %13 : vector<8x128xf32>
    %cst_11 = arith.constant 0.000000e+00 : f32
    %15 = vector.broadcast %cst_11 : f32 to vector<8x128xf32>
    %16 = arith.maximumf %14, %15 : vector<8x128xf32>
    %17 = arith.truncf %16 : vector<8x128xf32> to vector<8x128xbf16>
    %c0_12 = arith.constant 0 : index
    %c0_13 = arith.constant 0 : index
    %18 = vector.load %arg6[%c0_12, %c0_13] : memref<128x128xbf16, #tpu.memory_space<vmem>>, vector<128x128xbf16>
    %cst_14 = arith.constant dense<0.000000e+00> : vector<8x128xf32>
    %19 = tpu.matmul %17, %18, %cst_14 {dimension_numbers = #tpu.dot_dimension_numbers<[1], [0], [0], [1], [0, 0, 1, 1], [], []>} : vector<8x128xbf16>, vector<128x128xbf16>, vector<8x128xf32> -> vector<8x128xf32>
    %c0_15 = arith.constant 0 : index
    %c0_16 = arith.constant 0 : index
    %20 = vector.load %arg7[%c0_15, %c0_16] : memref<1x128xf32, #tpu.memory_space<vmem>>, vector<1x128xf32>
    %21 = vector.broadcast %20 : vector<1x128xf32> to vector<8x128xf32>
    %22 = arith.addf %19, %21 : vector<8x128xf32>
    %cst_17 = arith.constant 0.000000e+00 : f32
    %23 = vector.broadcast %cst_17 : f32 to vector<8x128xf32>
    %24 = arith.maximumf %22, %23 : vector<8x128xf32>
    %25 = arith.truncf %24 : vector<8x128xf32> to vector<8x128xbf16>
    %c0_18 = arith.constant 0 : index
    %c0_19 = arith.constant 0 : index
    %26 = vector.load %arg8[%c0_18, %c0_19] : memref<128x128xbf16, #tpu.memory_space<vmem>>, vector<128x128xbf16>
    %cst_20 = arith.constant dense<0.000000e+00> : vector<8x128xf32>
    %27 = tpu.matmul %25, %26, %cst_20 {dimension_numbers = #tpu.dot_dimension_numbers<[1], [0], [0], [1], [0, 0, 1, 1], [], []>} : vector<8x128xbf16>, vector<128x128xbf16>, vector<8x128xf32> -> vector<8x128xf32>
    %c0_21 = arith.constant 0 : index
    %c0_22 = arith.constant 0 : index
    %28 = vector.load %arg9[%c0_21, %c0_22] : memref<1x128xf32, #tpu.memory_space<vmem>>, vector<1x128xf32>
    %29 = vector.broadcast %28 : vector<1x128xf32> to vector<8x128xf32>
    %30 = arith.addf %27, %29 : vector<8x128xf32>
    %31 = arith.truncf %30 : vector<8x128xf32> to vector<8x128xbf16>
    %c0_23 = arith.constant 0 : index
    %c0_24 = arith.constant 0 : index
    %32 = vector.load %arg10[%c0_23, %c0_24] : memref<8x128xbf16, #tpu.memory_space<vmem>>, vector<8x128xbf16>
    tpu.vector_store %arg10[%c0_23, %c0_24], %31 {strides = array<i32>} : memref<8x128xbf16, #tpu.memory_space<vmem>>, vector<8x128xbf16>,
    return
  }
  func.func @transform_0(%arg0: i32) -> (i32, i32) {
    %c0_i32 = arith.constant 0 : i32
    %c0_i32_0 = arith.constant 0 : i32
    return %arg0, %c0_i32 : i32, i32
  }
  func.func @transform_1(%arg0: i32) -> (i32, i32) {
    %c0_i32 = arith.constant 0 : i32
    %c0_i32_0 = arith.constant 0 : i32
    %c0_i32_1 = arith.constant 0 : i32
    return %c0_i32, %c0_i32_0 : i32, i32
  }
  func.func @transform_2(%arg0: i32) -> (i32, i32) {
    %c0_i32 = arith.constant 0 : i32
    %c0_i32_0 = arith.constant 0 : i32
    %c0_i32_1 = arith.constant 0 : i32
    return %c0_i32, %c0_i32_0 : i32, i32
  }
  func.func @transform_3(%arg0: i32) -> (i32, i32) {
    %c0_i32 = arith.constant 0 : i32
    %c0_i32_0 = arith.constant 0 : i32
    %c0_i32_1 = arith.constant 0 : i32
    return %c0_i32, %c0_i32_0 : i32, i32
  }
  func.func @transform_4(%arg0: i32) -> (i32, i32) {
    %c0_i32 = arith.constant 0 : i32
    %c0_i32_0 = arith.constant 0 : i32
    %c0_i32_1 = arith.constant 0 : i32
    return %c0_i32, %c0_i32_0 : i32, i32
  }
  func.func @transform_5(%arg0: i32) -> (i32, i32) {
    %c0_i32 = arith.constant 0 : i32
    %c0_i32_0 = arith.constant 0 : i32
    %c0_i32_1 = arith.constant 0 : i32
    return %c0_i32, %c0_i32_0 : i32, i32
  }
  func.func @transform_6(%arg0: i32) -> (i32, i32) {
    %c0_i32 = arith.constant 0 : i32
    %c0_i32_0 = arith.constant 0 : i32
    %c0_i32_1 = arith.constant 0 : i32
    return %c0_i32, %c0_i32_0 : i32, i32
  }
  func.func @transform_7(%arg0: i32) -> (i32, i32) {
    %c0_i32 = arith.constant 0 : i32
    %c0_i32_0 = arith.constant 0 : i32
    %c0_i32_1 = arith.constant 0 : i32
    return %c0_i32, %c0_i32_0 : i32, i32
  }
  func.func @transform_8(%arg0: i32) -> (i32, i32) {
    %c0_i32 = arith.constant 0 : i32
    %c0_i32_0 = arith.constant 0 : i32
    %c0_i32_1 = arith.constant 0 : i32
    return %c0_i32, %c0_i32_0 : i32, i32
  }
  func.func @transform_9(%arg0: i32) -> (i32, i32) {
    %c0_i32 = arith.constant 0 : i32
    %c0_i32_0 = arith.constant 0 : i32
    return %arg0, %c0_i32 : i32, i32
  }
}

</mosaic_0001>

<bundles_post_ra>
// kernel: digit_recognizer_mlp.1
= control target key start
LH: loop header
LB: loop body
LE: loop exit
PB: predicated region body
PF: predicated region fallthrough
CT: control target
= control target key end

     0   :  { %s1509_s0 = inlined_call_operand.vmem [shape: f32[8,784], index: 0, kind: input, shape index: {}]   ;;  %s1510_s1 = inlined_call_operand.vmem [shape: bf16[784,128], index: 1, kind: input, shape index: {}]   ;;  %s1511_s2 = inlined_call_operand.vmem [shape: f32[1,128], index: 2, kind: input, shape index: {}]   ;;  %s1512_s3 = inlined_call_operand.vmem [shape: bf16[128,128], index: 3, kind: input, shape index: {}]   ;;  %s1513_s4 = inlined_call_operand.vmem [shape: f32[1,128], index: 4, kind: input, shape index: {}]   ;;  %s1514_s5 = inlined_call_operand.vmem [shape: bf16[128,128], index: 5, kind: input, shape index: {}]   ;;  %s1515_s6 = inlined_call_operand.vmem [shape: f32[1,128], index: 6, kind: input, shape index: {}]   ;;  %s1516_s7 = inlined_call_operand.vmem [shape: bf16[128,128], index: 7, kind: input, shape index: {}]   ;;  %s1517_s8 = inlined_call_operand.vmem [shape: f32[1,128], index: 8, kind: input, shape index: {}]   ;;  %s1518_s9 = inlined_call_operand.hbm [shape: bf16[8,128], index: 9, kind: output, shape index: {}]  }
   0x1   :  { %v1106_v0 = vld [vmem:[%s1510_s1 + $0x38] sm:$0xff]  ;;  %v1105_v3 = vld [vmem:[%s1510_s1 + $0x30] sm:$0xff]  ;;  %v1104_v8 = vld [vmem:[%s1510_s1 + $0x28] sm:$0xff] }
   0x2   :  { %v1114_v1 = vld [vmem:[%s1510_s1 + $0x78] sm:$0xff]  ;;  %448 = vmatpush.bf16.msra.mxu0 %v1106_v0  ;;  %v1113_v4 = vld [vmem:[%s1510_s1 + $0x70] sm:$0xff]  ;;  %v1112_v9 = vld [vmem:[%s1510_s1 + $0x68] sm:$0xff] }
   0x3   :  { %v1122_v2 = vld [vmem:[%s1510_s1 + $0xb8] sm:$0xff]  ;;  %461 = vmatpush.bf16.msra.mxu1 %v1114_v1  ;;  %v1121_v5 = vld [vmem:[%s1510_s1 + $0xb0] sm:$0xff]  ;;  %v1120_v10 = vld [vmem:[%s1510_s1 + $0xa8] sm:$0xff] }
   0x4   :  { %474 = vmatpush.bf16.msra.mxu2 %v1122_v2  ;;  %v1130_v6 = vld [vmem:[%s1510_s1 + $0xf8] sm:$0xff]  ;;  %v1129_v7 = vld [vmem:[%s1510_s1 + $0xf0] sm:$0xff]  ;;  %v1128_v11 = vld [vmem:[%s1510_s1 + $0xe8] sm:$0xff] }
   0x5   :  { %487 = vmatpush.bf16.msra.mxu3 %v1130_v6  ;;  %v1103_v12 = vld [vmem:[%s1510_s1 + $0x20] sm:$0xff]  ;;  %v1102_v16 = vld [vmem:[%s1510_s1 + $0x18] sm:$0xff]  ;;  %v1101_v20 = vld [vmem:[%s1510_s1 + $0x10] sm:$0xff] }
   0x6   :  { %449 = vmatpush.bf16.msra.mxu0 %v1105_v3  ;;  %v1111_v13 = vld [vmem:[%s1510_s1 + $0x60] sm:$0xff]  ;;  %v1110_v17 = vld [vmem:[%s1510_s1 + $0x58] sm:$0xff]  ;;  %v1109_v21 = vld [vmem:[%s1510_s1 + $0x50] sm:$0xff] }
   0x7   :  { %462 = vmatpush.bf16.msra.mxu1 %v1113_v4  ;;  %v1119_v14 = vld [vmem:[%s1510_s1 + $0xa0] sm:$0xff]  ;;  %v1118_v18 = vld [vmem:[%s1510_s1 + $0x98] sm:$0xff] }
   0x8   :  { %475 = vmatpush.bf16.msra.mxu2 %v1121_v5  ;;  %v1127_v15 = vld [vmem:[%s1510_s1 + $0xe0] sm:$0xff]  ;;  %v1126_v19 = vld [vmem:[%s1510_s1 + $0xd8] sm:$0xff] }
   0x9   :  { %488 = vmatpush.bf16.msra.mxu3 %v1129_v7 }
   0xa   :  { %450 = vmatpush.bf16.msra.mxu0 %v1104_v8 }
   0xb   :  { %463 = vmatpush.bf16.msra.mxu1 %v1112_v9 }
   0xc   :  { %476 = vmatpush.bf16.msra.mxu2 %v1120_v10 }
   0xd   :  { %489 = vmatpush.bf16.msra.mxu3 %v1128_v11 }
   0xe   :  { %451 = vmatpush.bf16.msra.mxu0 %v1103_v12 }
   0xf   :  { %464 = vmatpush.bf16.msra.mxu1 %v1111_v13 }
  0x10   :  { %477 = vmatpush.bf16.msra.mxu2 %v1119_v14 }
  0x11   :  { %490 = vmatpush.bf16.msra.mxu3 %v1127_v15 }
  0x12   :  { %452 = vmatpush.bf16.msra.mxu0 %v1102_v16 }
  0x13   :  { %465 = vmatpush.bf16.msra.mxu1 %v1110_v17 }
  0x14   :  { %14 = vsyncpa [#allocation3], 0  ;;  %478 = vmatpush.bf16.msra.mxu2 %v1118_v18  ;;  %v1117_v22 = vld [vmem:[%s1510_s1 + $0x90] sm:$0xff]  ;;  %v1100_v24 = vld [vmem:[%s1510_s1 + $0x8] sm:$0xff]  ;;  %vm444_vm0 = vcmask 130048   ;;  %s1203_s19 = smov [#allocation2]  }
  0x15   :  { %491 = vmatpush.bf16.msra.mxu3 %v1126_v19  ;;  %v1125_v23 = vld [vmem:[%s1510_s1 + $0xd0] sm:$0xff]  ;;  %v1108_v25 = vld [vmem:[%s1510_s1 + $0x48] sm:$0xff]  ;;  %v1099_v27 = vld [vmem:[%s1510_s1] sm:$0xff]  ;;  %s795_s20 = sshll.u32 %s1203_s19, 4  ;;  %s797_s21 = sshll.u32 %s1518_s9, 4  ;;  %s796_s20 = int_to_ptr.vmem [resolvable:$true] %s795_s20  ;;  %s798_s21 = int_to_ptr.hbm [resolvable:$true] %s797_s21 }
  0x16   :  { %453 = vmatpush.bf16.msra.mxu0 %v1101_v20  ;;  %v1116_v26 = vld [vmem:[%s1510_s1 + $0x88] sm:$0xff]  ;;  %v1107_v29 = vld [vmem:[%s1510_s1 + $0x40] sm:$0xff]  ;;  %v1138_v32 = vld [vmem:[%s1510_s1 + $0x138] sm:$0xff] }
  0x17   :  { %466 = vmatpush.bf16.msra.mxu1 %v1109_v21  ;;  %v1124_v28 = vld [vmem:[%s1510_s1 + $0xc8] sm:$0xff]  ;;  %v34_v30 = vld [vmem:[%s1509_s0] sm:$0xff]  ;;  %v1146_v33 = vld [vmem:[%s1510_s1 + $0x178] sm:$0xff] }
  0x18   :  { %479 = vmatpush.bf16.msra.mxu2 %v1117_v22  ;;  %v35_v31 = vld [vmem:[%s1509_s0 + $0x8] sm:$0xff]  ;;  %v1115_v34 = vld [vmem:[%s1510_s1 + $0x80] sm:$0xff]  ;;  %v36_v35 = vld [vmem:[%s1509_s0 + $0x10] sm:$0xff]  ;;  %v41_v36 = vpack.c.bf16 %v34_v30, %v34_v30 }
  0x19   :  { %492 = vmatpush.bf16.msra.mxu3 %v1125_v23  ;;  %v42_v37 = vpack.c.bf16 %v35_v31, %v35_v31  ;;  %v1123_v38 = vld [vmem:[%s1510_s1 + $0xc0] sm:$0xff]  ;;  %v37_v40 = vld [vmem:[%s1509_s0 + $0x18] sm:$0xff]  ;;  %v1137_v41 = vld [vmem:[%s1510_s1 + $0x130] sm:$0xff]  ;;  %v43_v43 = vpack.c.bf16 %v36_v35, %v36_v35 }
  0x1a   :  { %454 = vmatpush.bf16.msra.mxu0 %v1100_v24  ;;  %v1147_v39 = vld [vmem:[%s1510_s1 + $0x180] sm:$0xff]  ;;  %v1145_v42 = vld [vmem:[%s1510_s1 + $0x170] sm:$0xff]  ;;  %v44_v44 = vpack.c.bf16 %v37_v40, %v37_v40  ;;  %v1136_v45 = vld [vmem:[%s1510_s1 + $0x128] sm:$0xff] }
  0x1b   :  { %467 = vmatpush.bf16.msra.mxu1 %v1108_v25  ;;  %v1144_v46 = vld [vmem:[%s1510_s1 + $0x168] sm:$0xff]  ;;  %v1135_v47 = vld [vmem:[%s1510_s1 + $0x120] sm:$0xff]  ;;  %v1134_v49 = vld [vmem:[%s1510_s1 + $0x118] sm:$0xff] }
  0x1c   :  { %480 = vmatpush.bf16.msra.mxu2 %v1116_v26  ;;  %v1143_v48 = vld [vmem:[%s1510_s1 + $0x160] sm:$0xff]  ;;  %v1142_v50 = vld [vmem:[%s1510_s1 + $0x158] sm:$0xff]  ;;  %v40_v51 = vld [vmem:[%s1509_s0 + $0x30] sm:$0xff] }
  0x1d   :  { %493 = vmatpush.bf16.msra.mxu3 %v1124_v28  ;;  %v1133_v52 = vld [vmem:[%s1510_s1 + $0x110] sm:$0xff]  ;;  %v47_v54 = vpack.c.bf16 %v40_v51, %v40_v51  ;;  %v1132_v55 = vld [vmem:[%s1510_s1 + $0x108] sm:$0xff]  ;;  %v1131_v57 = vld [vmem:[%s1510_s1 + $0x100] sm:$0xff] }
  0x1e   :  { %455 = vmatpush.bf16.msra.mxu0 %v1099_v27  ;;  %v1141_v53 = vld [vmem:[%s1510_s1 + $0x150] sm:$0xff]  ;;  %v1140_v56 = vld [vmem:[%s1510_s1 + $0x148] sm:$0xff]  ;;  %v1139_v58 = vld [vmem:[%s1510_s1 + $0x140] sm:$0xff] }
  0x1f   :  { %468 = vmatpush.bf16.msra.mxu1 %v1107_v29  ;;  %v38_v59 = vld [vmem:[%s1509_s0 + $0x20] sm:$0xff]  ;;  %v39_v60 = vld [vmem:[%s1509_s0 + $0x28] sm:$0xff]  ;;  %v1155_v63 = vld [vmem:[%s1512_s3 + $0x38] sm:$0xff] }
  0x20   :  { %481 = vmatpush.bf16.msra.mxu2 %v1115_v34  ;;  %v45_v61 = vpack.c.bf16 %v38_v59, %v38_v59  ;;  %v46_v62 = vpack.c.bf16 %v39_v60, %v39_v60  ;;  %v1154_v0 = vld [vmem:[%s1512_s3 + $0x30] sm:$0xff]  ;;  %v1153_v1 = vld [vmem:[%s1512_s3 + $0x28] sm:$0xff]  ;;  %v1152_v2 = vld [vmem:[%s1512_s3 + $0x20] sm:$0xff] }
  0x21   :  { %456 = vmatmul.bf16.vlgmr.msra.gmra.mxu0 %v41_v36  ;;  %494 = vmatpush.bf16.msra.mxu3 %v1123_v38  ;;  %v1151_v3 = vld [vmem:[%s1512_s3 + $0x18] sm:$0xff]  ;;  %v1150_v4 = vld [vmem:[%s1512_s3 + $0x10] sm:$0xff]  ;;  %v1149_v5 = vld [vmem:[%s1512_s3 + $0x8] sm:$0xff] }
  0x22   :  { %500 = vmatpush.bf16.msrb.mxu0 %v1138_v32  ;;  %469 = vmatmul.bf16.vlgmr.msra.gmra.mxu1 %v42_v37  ;;  %v1148_v8 = vld [vmem:[%s1512_s3] sm:$0xff]  ;;  %v1163_v11 = vld [vmem:[%s1514_s5 + $0x38] sm:$0xff]  ;;  %v1162_v14 = vld [vmem:[%s1514_s5 + $0x30] sm:$0xff] }
  0x23   :  { %513 = vmatpush.bf16.msrb.mxu1 %v1146_v33  ;;  %482 = vmatmul.bf16.vlgmr.msra.gmra.mxu2 %v43_v43  ;;  %v1173_v15 = vld [vmem:[%s1511_s2] ss:$0 sm:$0xff]  ;;  %v1161_v16 = vld [vmem:[%s1514_s5 + $0x28] sm:$0xff]  ;;  %v1159_v22 = vld [vmem:[%s1514_s5 + $0x18] sm:$0xff] }
  0x24   :  { %533 = vmatpush.bf16.msrb.mxu2 %v1147_v39  ;;  %495 = vmatmul.bf16.vlgmr.msra.gmra.mxu3 %v44_v44  ;;  %v1160_v20 = vld [vmem:[%s1514_s5 + $0x20] sm:$0xff]  ;;  %v1158_v25 = vld [vmem:[%s1514_s5 + $0x10] sm:$0xff]  ;;  %v1157_v37 = vld [vmem:[%s1514_s5 + $0x8] sm:$0xff] }
  0x25   :  { %609 = vmatpush.bf16.msrb.mxu3 %v1155_v63  ;;  %v1156_v38 = vld [vmem:[%s1514_s5] sm:$0xff]  ;;  %v1171_v39 = vld [vmem:[%s1516_s7 + $0x38] sm:$0xff]  ;;  %v1170_v40 = vld [vmem:[%s1516_s7 + $0x30] sm:$0xff] }
  0x26   :  { %501 = vmatpush.bf16.msrb.mxu0 %v1137_v41  ;;  %v1169_v41 = vld [vmem:[%s1516_s7 + $0x28] sm:$0xff]  ;;  %v1167_v43 = vld [vmem:[%s1516_s7 + $0x18] sm:$0xff]  ;;  %v1166_v44 = vld [vmem:[%s1516_s7 + $0x10] sm:$0xff] }
  0x27   :  { %514 = vmatpush.bf16.msrb.mxu1 %v1145_v42  ;;  %v1168_v42 = vld [vmem:[%s1516_s7 + $0x20] sm:$0xff]  ;;  %v1165_v51 = vld [vmem:[%s1516_s7 + $0x8] sm:$0xff] }
  0x28   :  { %692 = vmatpush.bf16.msra.mxu2 %v1163_v11  ;;  %v1176_v59 = vld [vmem:[%s1517_s8] ss:$0 sm:$0xff] }
  0x29   :  { %610 = vmatpush.bf16.msrb.mxu3 %v1154_v0 }
  0x2a   :  { %502 = vmatpush.bf16.msrb.mxu0 %v1136_v45  ;;  %v1174_v45 = vld [vmem:[%s1513_s4] ss:$0 sm:$0xff] }
  0x2b   :  { %515 = vmatpush.bf16.msrb.mxu1 %v1144_v46 }
  0x2c   :  { %693 = vmatpush.bf16.msra.mxu2 %v1162_v14 }
  0x2d   :  { %611 = vmatpush.bf16.msrb.mxu3 %v1153_v1 }
  0x2e   :  { %503 = vmatpush.bf16.msrb.mxu0 %v1135_v47 }
  0x2f   :  { %516 = vmatpush.bf16.msrb.mxu1 %v1143_v48 }
  0x30   :  { %694 = vmatpush.bf16.msra.mxu2 %v1161_v16 }
  0x31   :  { %612 = vmatpush.bf16.msrb.mxu3 %v1152_v2 }
  0x32   :  { %504 = vmatpush.bf16.msrb.mxu0 %v1134_v49 }
  0x33   :  { %517 = vmatpush.bf16.msrb.mxu1 %v1142_v50  ;;  %1002 = vmatmul.msk.bf16.vlgmr.msrb.gmra.mxu2 %vm444_vm0, %v47_v54 }
  0x34   :  { %695 = vmatpush.bf16.msra.mxu2 %v1160_v20 }
  0x35   :  { %613 = vmatpush.bf16.msrb.mxu3 %v1151_v3 }
  0x36   :  { %505 = vmatpush.bf16.msrb.mxu0 %v1133_v52  ;;  %v1164_v52 = vld [vmem:[%s1516_s7] sm:$0xff] }
  0x37   :  { %518 = vmatpush.bf16.msrb.mxu1 %v1141_v53  ;;  %v1175_v53 = vld [vmem:[%s1515_s6] ss:$0 sm:$0xff] }
  0x38   :  { %696 = vmatpush.bf16.msra.mxu2 %v1159_v22 }
  0x39   :  { %614 = vmatpush.bf16.msrb.mxu3 %v1150_v4 }
  0x3a   :  { %506 = vmatpush.bf16.msrb.mxu0 %v1132_v55 }
  0x3b   :  { %519 = vmatpush.bf16.msrb.mxu1 %v1140_v56 }
  0x3c   :  { %697 = vmatpush.bf16.msra.mxu2 %v1158_v25 }
  0x3d   :  { %615 = vmatpush.bf16.msrb.mxu3 %v1149_v5 }
  0x3e   :  { %507 = vmatpush.bf16.msrb.mxu0 %v1131_v57 }
  0x3f   :  { %520 = vmatpush.bf16.msrb.mxu1 %v1139_v58 }
  0x40   :  { %698 = vmatpush.bf16.msra.mxu2 %v1157_v37 }
  0x41   :  { %508 = vmatmul.bf16.vlgmr.msrb.gmra.mxu0 %v45_v61  ;;  %616 = vmatpush.bf16.msrb.mxu3 %v1148_v8 }
  0x42   :  { %521 = vmatmul.bf16.vlgmr.msrb.gmra.mxu1 %v46_v62  ;;  %775 = vmatpush.bf16.msra.mxu0 %v1171_v39 }
  0x44   :  { %699 = vmatpush.bf16.msra.mxu2 %v1156_v38 }
  0x46   :  { %776 = vmatpush.bf16.msra.mxu0 %v1170_v40 }
  0x4a   :  { %777 = vmatpush.bf16.msra.mxu0 %v1169_v41 }
  0x4e   :  { %778 = vmatpush.bf16.msra.mxu0 %v1168_v42 }
  0x52   :  { %779 = vmatpush.bf16.msra.mxu0 %v1167_v43 }
  0x56   :  { %780 = vmatpush.bf16.msra.mxu0 %v1166_v44 }
  0x5a   :  { %781 = vmatpush.bf16.msra.mxu0 %v1165_v51 }
  0x5e   :  { %782 = vmatpush.bf16.msra.mxu0 %v1164_v52 }
  0x9e   :  { %v457_v6 = vpop.f32.mrf.mxu0 }
  0x9f   :  { %v470_v7 = vpop.f32.mrf.mxu1  ;;  %v458_v17 = vadd.f32 %v1173_v15, %v457_v6 }
  0xa1   :  { %v471_v21 = vadd.f32 %v470_v7, %v458_v17 }
  0xa6   :  { %v459_v9 = vpop.f32.mrf.mxu0  ;;  %v483_v12 = vpop.f32.mrf.mxu2 }
  0xa7   :  { %v472_v10 = vpop.f32.mrf.mxu1  ;;  %v496_v13 = vpop.f32.mrf.mxu3  ;;  %v484_v23 = vadd.f32 %v483_v12, %v471_v21 }
  0xa9   :  { %v497_v26 = vadd.f32 %v496_v13, %v484_v23 }
  0xae   :  { %v485_v18 = vpop.f32.mrf.mxu2 }
  0xaf   :  { %v498_v19 = vpop.f32.mrf.mxu3 }
  0xb6   :  { %v535_v24 = vpop.f32.mrf.mxu2 }
  0xbe   :  { %v509_v27 = vpop.f32.mrf.mxu0  ;;  %v537_v31 = vpop.f32.mrf.mxu2 }
  0xbf   :  { %v522_v28 = vpop.f32.mrf.mxu1  ;;  %v510_v29 = vadd.f32 %v509_v27, %v497_v26 }
  0xc1   :  { %v523_v30 = vadd.f32 %v522_v28, %v510_v29 }
  0xc3   :  { %v536_v32 = vadd.f32 %v535_v24, %v523_v30 }
  0xc5   :  { %v539_v33 = vmax.f32 %v536_v32, 0.0 }
  0xc6   :  { %v511_v34 = vpop.f32.mrf.mxu0 }
  0xc7   :  { %v524_v35 = vpop.f32.mrf.mxu1  ;;  %v540_v36 = vpack.c.bf16 %v539_v33, %v539_v33 }
  0xc9   :  { %617 = vmatmul.bf16.vlgmr.msrb.gmra.mxu3 %v540_v36 }
 0x14c   :  { %v618_v46 = vpop.f32.mrf.mxu3 }
 0x14d   :  { %v619_v47 = vadd.f32 %v1174_v45, %v618_v46 }
 0x14f   :  { %v622_v48 = vmax.f32 %v619_v47, 0.0 }
 0x151   :  { %v623_v49 = vpack.c.bf16 %v622_v48, %v622_v48 }
 0x153   :  { %700 = vmatmul.bf16.vlgmr.msra.gmra.mxu2 %v623_v49 }
 0x154   :  { %v620_v50 = vpop.f32.mrf.mxu3 }
 0x1d6   :  { %v701_v54 = vpop.f32.mrf.mxu2 }
 0x1d7   :  { %v702_v55 = vadd.f32 %v1175_v53, %v701_v54 }
 0x1d9   :  { %v705_v56 = vmax.f32 %v702_v55, 0.0 }
 0x1db   :  { %v706_v57 = vpack.c.bf16 %v705_v56, %v705_v56 }
 0x1dd   :  { %783 = vmatmul.bf16.vlgmr.msra.gmra.mxu0 %v706_v57 }
 0x1de   :  { %v703_v58 = vpop.f32.mrf.mxu2 }
 0x25a   :  { %v784_v60 = vpop.f32.mrf.mxu0 }
 0x25b   :  { %v785_v61 = vadd.f32 %v1176_v59, %v784_v60 }
 0x25d   :  { %v788_v62 = vpack.c.bf16 %v785_v61, %v785_v61 }
 0x25f   :  { %789 = vst [vmem:[#allocation2] sm:$0xf] %v788_v62 }
 0x260   :  { %800 = dma.vmem_to_hbm [thread:$0]  %s796_s20, 64, %s798_s21, [#allocation3]  }
 0x262   :  { %v786_v63 = vpop.f32.mrf.mxu0 }
 0x263   :  { %1201 = dma.done.wait [#allocation3], 64  }
 0x264   :  { %1202 = vsyncadd [#allocation3], 4294967232 }
 0x265   :  { %805 = vsyncpa [#allocation3], 1 }

</bundles_post_ra>
